<compile_context>
chip_gen: v7x
topology: tpu7x:2x2x1
jax: 0.10.0
libtpu: 0.0.40
codegen_flags: <defaults>
</compile_context>

<pallas_src>
import functools

import jax
import jax.numpy as jnp
from jax import lax
from jax.experimental import pallas as pl
from jax.experimental.pallas import tpu as pltpu

NUM_CLASSES = 12
OUT_FEATURES = 784
BN_EPS = 1e-5


def condition_kernel(labels_ref, w_ref, gb_ref, out_ref, *, alpha, eps):
    """labels_ref: (B, 1) int32 VMEM; w_ref: (12, 784) VMEM;
    gb_ref: (2, 784) VMEM ([gamma; beta]); out_ref: (B, 784) VMEM."""
    B = out_ref.shape[0]

    lbl = labels_ref[...]                                  # (B, 1) int32

    # one_hot(labels) @ W is a row gather of W. Implement it as a 12-way
    # static-row select-accumulate (pure VPU cmp+sel, no scalar-indexed loads,
    # no scratch). Out-of-range labels produce an all-zero row (PyTorch's
    # F.one_hot would raise instead).
    x = jnp.zeros((B, OUT_FEATURES), jnp.float32)
    for c in range(NUM_CLASSES):                           # static unroll
        row = w_ref[pl.ds(c, 1), :]                        # (1, 784), static slice
        x = jnp.where(lbl == c, row, x)                    # (B, 784)

    # (Linear bias omitted: it cancels under the batch-mean subtraction below.)

    # BatchNorm1d(784), training-mode batch statistics, single reduction pass.
    inv_b = jnp.float32(1.0 / B)
    s1 = jnp.sum(x, axis=0, keepdims=True)                 # (1, 784)
    s2 = jnp.sum(x * x, axis=0, keepdims=True)             # (1, 784)
    mean = s1 * inv_b
    var = jnp.maximum(s2 * inv_b - mean * mean, 0.0)       # guarded biased var

    gamma = gb_ref[pl.ds(0, 1), :]                         # (1, 784)
    beta = gb_ref[pl.ds(1, 1), :]                          # (1, 784)

    # Fold BN affine into per-feature scale/shift (computed once on 1x784).
    g = gamma * lax.rsqrt(var + eps)                       # (1, 784)
    b2 = beta - mean * g                                   # (1, 784)
    y = x * g + b2                                         # (B, 784)

    # LeakyReLU(alpha). max(y, alpha*y) == leaky_relu for 0 <= alpha <= 1.
    if 0.0 <= alpha <= 1.0:
        out_ref[...] = jnp.maximum(y, alpha * y)
    else:
        out_ref[...] = jnp.where(y >= 0.0, y, alpha * y)


def condition_forward(labels, w, gamma, beta, *, alpha):
    """labels: (B,) int -> (B, 784) float32.

    w: (12, 784) = (in_features, out_features); gamma/beta: (1, 784).
    The Linear bias is intentionally not an input (it cancels under BN).
    """
    B = labels.shape[0]
    labels2d = labels.astype(jnp.int32).reshape(B, 1)
    gb = jnp.concatenate(
        [gamma.reshape(1, OUT_FEATURES), beta.reshape(1, OUT_FEATURES)], axis=0)

    kernel = functools.partial(condition_kernel, alpha=alpha, eps=BN_EPS)
    bytes_accessed = (B * 4
                      + NUM_CLASSES * OUT_FEATURES * 4
                      + 2 * OUT_FEATURES * 4
                      + B * OUT_FEATURES * 4)

    return pl.pallas_call(
        kernel,
        out_shape=jax.ShapeDtypeStruct((B, OUT_FEATURES), jnp.float32),
        in_specs=[
            pl.BlockSpec(memory_space=pltpu.VMEM),   # labels (B, 1) int32
            pl.BlockSpec(memory_space=pltpu.VMEM),   # W (12, 784)
            pl.BlockSpec(memory_space=pltpu.VMEM),   # [gamma; beta] (2, 784)
        ],
        out_specs=pl.BlockSpec(memory_space=pltpu.VMEM),
        cost_estimate=pl.CostEstimate(
            flops=(12 + 8) * B * OUT_FEATURES,
            transcendentals=0,
            bytes_accessed=bytes_accessed),
    )(labels2d, w, gb)


def reference_forward(labels, w, b, gamma, beta, *, alpha):
    """Pure-JAX reference that includes the Linear bias (which cancels)."""
    one_hot = jax.nn.one_hot(labels, NUM_CLASSES, dtype=jnp.float32)
    x = one_hot @ w + b
    mean = jnp.mean(x, axis=0, keepdims=True)
    var = jnp.mean((x - mean) ** 2, axis=0, keepdims=True)
    y = gamma * (x - mean) / jnp.sqrt(var + BN_EPS) + beta
    return jnp.where(y >= 0.0, y, alpha * y)


if __name__ == "__main__":
    alpha = 0.2
    B = 8

    key = jax.random.PRNGKey(0)
    k_lab, k_w, k_b = jax.random.split(key, 3)

    # Deterministic parameter init (PyTorch-style uniform bound 1/sqrt(fan_in)).
    bound = 1.0 / jnp.sqrt(float(NUM_CLASSES))
    w = jax.random.uniform(k_w, (NUM_CLASSES, OUT_FEATURES),
                           minval=-bound, maxval=bound, dtype=jnp.float32)
    b = jax.random.uniform(k_b, (1, OUT_FEATURES),
                           minval=-bound, maxval=bound, dtype=jnp.float32)
    gamma = jnp.ones((1, OUT_FEATURES), jnp.float32)   # BatchNorm weight
    beta = jnp.zeros((1, OUT_FEATURES), jnp.float32)   # BatchNorm bias

    labels = jax.random.randint(k_lab, (B,), 0, NUM_CLASSES, dtype=jnp.int32)

    out = condition_forward(labels, w, gamma, beta, alpha=alpha)
    out = jax.block_until_ready(out)

    ref = reference_forward(labels, w, b, gamma, beta, alpha=alpha)
    assert out.shape == (B, OUT_FEATURES)
    assert jnp.allclose(out, ref, atol=1e-4, rtol=1e-4), "mismatch vs JAX reference"

    print("KERNEL_OK")
</pallas_src>

<mosaic_0001>
module attributes {stable_mosaic.version = 11 : i64} {
  func.func @condition_kernel(%arg0: memref<8x1xi32, #tpu.memory_space<vmem>>, %arg1: memref<12x784xf32, #tpu.memory_space<vmem>>, %arg2: memref<2x784xf32, #tpu.memory_space<vmem>>, %arg3: memref<8x784xf32, #tpu.memory_space<vmem>>) attributes {dimension_semantics = [], scalar_prefetch = 0 : i64, scratch_operands = 0 : i64, tpu.core_type = #tpu.core_type<tc>} {
    %c0 = arith.constant 0 : index
    %c0_0 = arith.constant 0 : index
    %0 = vector.load %arg0[%c0, %c0_0] : memref<8x1xi32, #tpu.memory_space<vmem>>, vector<8x1xi32>
    %cst = arith.constant 0.000000e+00 : f32
    %1 = vector.broadcast %cst : f32 to vector<8x784xf32>
    %c0_1 = arith.constant 0 : index
    %c0_2 = arith.constant 0 : index
    %2 = vector.load %arg1[%c0_1, %c0_2] : memref<12x784xf32, #tpu.memory_space<vmem>>, vector<1x784xf32>
    %c0_i32 = arith.constant 0 : i32
    %3 = vector.broadcast %c0_i32 : i32 to vector<8x1xi32>
    %4 = arith.cmpi eq, %0, %3 : vector<8x1xi32>
    %5 = vector.shape_cast %4 : vector<8x1xi1> to vector<8x1xi1>
    %6 = vector.broadcast %5 : vector<8x1xi1> to vector<8x784xi1>
    %7 = vector.shape_cast %2 : vector<1x784xf32> to vector<1x784xf32>
    %8 = vector.broadcast %7 : vector<1x784xf32> to vector<8x784xf32>
    %9 = arith.select %6, %8, %1 : vector<8x784xi1>, vector<8x784xf32>
    %c1 = arith.constant 1 : index
    %c0_3 = arith.constant 0 : index
    %10 = vector.load %arg1[%c1, %c0_3] : memref<12x784xf32, #tpu.memory_space<vmem>>, vector<1x784xf32>
    %c1_i32 = arith.constant 1 : i32
    %11 = vector.broadcast %c1_i32 : i32 to vector<8x1xi32>
    %12 = arith.cmpi eq, %0, %11 : vector<8x1xi32>
    %13 = vector.shape_cast %12 : vector<8x1xi1> to vector<8x1xi1>
    %14 = vector.broadcast %13 : vector<8x1xi1> to vector<8x784xi1>
    %15 = vector.shape_cast %10 : vector<1x784xf32> to vector<1x784xf32>
    %16 = vector.broadcast %15 : vector<1x784xf32> to vector<8x784xf32>
    %17 = arith.select %14, %16, %9 : vector<8x784xi1>, vector<8x784xf32>
    %c2 = arith.constant 2 : index
    %c0_4 = arith.constant 0 : index
    %18 = vector.load %arg1[%c2, %c0_4] : memref<12x784xf32, #tpu.memory_space<vmem>>, vector<1x784xf32>
    %c2_i32 = arith.constant 2 : i32
    %19 = vector.broadcast %c2_i32 : i32 to vector<8x1xi32>
    %20 = arith.cmpi eq, %0, %19 : vector<8x1xi32>
    %21 = vector.shape_cast %20 : vector<8x1xi1> to vector<8x1xi1>
    %22 = vector.broadcast %21 : vector<8x1xi1> to vector<8x784xi1>
    %23 = vector.shape_cast %18 : vector<1x784xf32> to vector<1x784xf32>
    %24 = vector.broadcast %23 : vector<1x784xf32> to vector<8x784xf32>
    %25 = arith.select %22, %24, %17 : vector<8x784xi1>, vector<8x784xf32>
    %c3 = arith.constant 3 : index
    %c0_5 = arith.constant 0 : index
    %26 = vector.load %arg1[%c3, %c0_5] : memref<12x784xf32, #tpu.memory_space<vmem>>, vector<1x784xf32>
    %c3_i32 = arith.constant 3 : i32
    %27 = vector.broadcast %c3_i32 : i32 to vector<8x1xi32>
    %28 = arith.cmpi eq, %0, %27 : vector<8x1xi32>
    %29 = vector.shape_cast %28 : vector<8x1xi1> to vector<8x1xi1>
    %30 = vector.broadcast %29 : vector<8x1xi1> to vector<8x784xi1>
    %31 = vector.shape_cast %26 : vector<1x784xf32> to vector<1x784xf32>
    %32 = vector.broadcast %31 : vector<1x784xf32> to vector<8x784xf32>
    %33 = arith.select %30, %32, %25 : vector<8x784xi1>, vector<8x784xf32>
    %c4 = arith.constant 4 : index
    %c0_6 = arith.constant 0 : index
    %34 = vector.load %arg1[%c4, %c0_6] : memref<12x784xf32, #tpu.memory_space<vmem>>, vector<1x784xf32>
    %c4_i32 = arith.constant 4 : i32
    %35 = vector.broadcast %c4_i32 : i32 to vector<8x1xi32>
    %36 = arith.cmpi eq, %0, %35 : vector<8x1xi32>
    %37 = vector.shape_cast %36 : vector<8x1xi1> to vector<8x1xi1>
    %38 = vector.broadcast %37 : vector<8x1xi1> to vector<8x784xi1>
    %39 = vector.shape_cast %34 : vector<1x784xf32> to vector<1x784xf32>
    %40 = vector.broadcast %39 : vector<1x784xf32> to vector<8x784xf32>
    %41 = arith.select %38, %40, %33 : vector<8x784xi1>, vector<8x784xf32>
    %c5 = arith.constant 5 : index
    %c0_7 = arith.constant 0 : index
    %42 = vector.load %arg1[%c5, %c0_7] : memref<12x784xf32, #tpu.memory_space<vmem>>, vector<1x784xf32>
    %c5_i32 = arith.constant 5 : i32
    %43 = vector.broadcast %c5_i32 : i32 to vector<8x1xi32>
    %44 = arith.cmpi eq, %0, %43 : vector<8x1xi32>
    %45 = vector.shape_cast %44 : vector<8x1xi1> to vector<8x1xi1>
    %46 = vector.broadcast %45 : vector<8x1xi1> to vector<8x784xi1>
    %47 = vector.shape_cast %42 : vector<1x784xf32> to vector<1x784xf32>
    %48 = vector.broadcast %47 : vector<1x784xf32> to vector<8x784xf32>
    %49 = arith.select %46, %48, %41 : vector<8x784xi1>, vector<8x784xf32>
    %c6 = arith.constant 6 : index
    %c0_8 = arith.constant 0 : index
    %50 = vector.load %arg1[%c6, %c0_8] : memref<12x784xf32, #tpu.memory_space<vmem>>, vector<1x784xf32>
    %c6_i32 = arith.constant 6 : i32
    %51 = vector.broadcast %c6_i32 : i32 to vector<8x1xi32>
    %52 = arith.cmpi eq, %0, %51 : vector<8x1xi32>
    %53 = vector.shape_cast %52 : vector<8x1xi1> to vector<8x1xi1>
    %54 = vector.broadcast %53 : vector<8x1xi1> to vector<8x784xi1>
    %55 = vector.shape_cast %50 : vector<1x784xf32> to vector<1x784xf32>
    %56 = vector.broadcast %55 : vector<1x784xf32> to vector<8x784xf32>
    %57 = arith.select %54, %56, %49 : vector<8x784xi1>, vector<8x784xf32>
    %c7 = arith.constant 7 : index
    %c0_9 = arith.constant 0 : index
    %58 = vector.load %arg1[%c7, %c0_9] : memref<12x784xf32, #tpu.memory_space<vmem>>, vector<1x784xf32>
    %c7_i32 = arith.constant 7 : i32
    %59 = vector.broadcast %c7_i32 : i32 to vector<8x1xi32>
    %60 = arith.cmpi eq, %0, %59 : vector<8x1xi32>
    %61 = vector.shape_cast %60 : vector<8x1xi1> to vector<8x1xi1>
    %62 = vector.broadcast %61 : vector<8x1xi1> to vector<8x784xi1>
    %63 = vector.shape_cast %58 : vector<1x784xf32> to vector<1x784xf32>
    %64 = vector.broadcast %63 : vector<1x784xf32> to vector<8x784xf32>
    %65 = arith.select %62, %64, %57 : vector<8x784xi1>, vector<8x784xf32>
    %c8 = arith.constant 8 : index
    %c0_10 = arith.constant 0 : index
    %66 = vector.load %arg1[%c8, %c0_10] : memref<12x784xf32, #tpu.memory_space<vmem>>, vector<1x784xf32>
    %c8_i32 = arith.constant 8 : i32
    %67 = vector.broadcast %c8_i32 : i32 to vector<8x1xi32>
    %68 = arith.cmpi eq, %0, %67 : vector<8x1xi32>
    %69 = vector.shape_cast %68 : vector<8x1xi1> to vector<8x1xi1>
    %70 = vector.broadcast %69 : vector<8x1xi1> to vector<8x784xi1>
    %71 = vector.shape_cast %66 : vector<1x784xf32> to vector<1x784xf32>
    %72 = vector.broadcast %71 : vector<1x784xf32> to vector<8x784xf32>
    %73 = arith.select %70, %72, %65 : vector<8x784xi1>, vector<8x784xf32>
    %c9 = arith.constant 9 : index
    %c0_11 = arith.constant 0 : index
    %74 = vector.load %arg1[%c9, %c0_11] : memref<12x784xf32, #tpu.memory_space<vmem>>, vector<1x784xf32>
    %c9_i32 = arith.constant 9 : i32
    %75 = vector.broadcast %c9_i32 : i32 to vector<8x1xi32>
    %76 = arith.cmpi eq, %0, %75 : vector<8x1xi32>
    %77 = vector.shape_cast %76 : vector<8x1xi1> to vector<8x1xi1>
    %78 = vector.broadcast %77 : vector<8x1xi1> to vector<8x784xi1>
    %79 = vector.shape_cast %74 : vector<1x784xf32> to vector<1x784xf32>
    %80 = vector.broadcast %79 : vector<1x784xf32> to vector<8x784xf32>
    %81 = arith.select %78, %80, %73 : vector<8x784xi1>, vector<8x784xf32>
    %c10 = arith.constant 10 : index
    %c0_12 = arith.constant 0 : index
    %82 = vector.load %arg1[%c10, %c0_12] : memref<12x784xf32, #tpu.memory_space<vmem>>, vector<1x784xf32>
    %c10_i32 = arith.constant 10 : i32
    %83 = vector.broadcast %c10_i32 : i32 to vector<8x1xi32>
    %84 = arith.cmpi eq, %0, %83 : vector<8x1xi32>
    %85 = vector.shape_cast %84 : vector<8x1xi1> to vector<8x1xi1>
    %86 = vector.broadcast %85 : vector<8x1xi1> to vector<8x784xi1>
    %87 = vector.shape_cast %82 : vector<1x784xf32> to vector<1x784xf32>
    %88 = vector.broadcast %87 : vector<1x784xf32> to vector<8x784xf32>
    %89 = arith.select %86, %88, %81 : vector<8x784xi1>, vector<8x784xf32>
    %c11 = arith.constant 11 : index
    %c0_13 = arith.constant 0 : index
    %90 = vector.load %arg1[%c11, %c0_13] : memref<12x784xf32, #tpu.memory_space<vmem>>, vector<1x784xf32>
    %c11_i32 = arith.constant 11 : i32
    %91 = vector.broadcast %c11_i32 : i32 to vector<8x1xi32>
    %92 = arith.cmpi eq, %0, %91 : vector<8x1xi32>
    %93 = vector.shape_cast %92 : vector<8x1xi1> to vector<8x1xi1>
    %94 = vector.broadcast %93 : vector<8x1xi1> to vector<8x784xi1>
    %95 = vector.shape_cast %90 : vector<1x784xf32> to vector<1x784xf32>
    %96 = vector.broadcast %95 : vector<1x784xf32> to vector<8x784xf32>
    %97 = arith.select %94, %96, %89 : vector<8x784xi1>, vector<8x784xf32>
    %cst_14 = arith.constant dense<0.000000e+00> : vector<784xf32>
    %98 = vector.multi_reduction <add>, %97, %cst_14 [0] : vector<8x784xf32> to vector<784xf32>
    %99 = vector.shape_cast %98 : vector<784xf32> to vector<1x784xf32>
    %100 = arith.mulf %97, %97 : vector<8x784xf32>
    %cst_15 = arith.constant dense<0.000000e+00> : vector<784xf32>
    %101 = vector.multi_reduction <add>, %100, %cst_15 [0] : vector<8x784xf32> to vector<784xf32>
    %102 = vector.shape_cast %101 : vector<784xf32> to vector<1x784xf32>
    %cst_16 = arith.constant 1.250000e-01 : f32
    %103 = vector.broadcast %cst_16 : f32 to vector<1x784xf32>
    %104 = arith.mulf %99, %103 : vector<1x784xf32>
    %cst_17 = arith.constant 1.250000e-01 : f32
    %105 = vector.broadcast %cst_17 : f32 to vector<1x784xf32>
    %106 = arith.mulf %102, %105 : vector<1x784xf32>
    %107 = arith.mulf %104, %104 : vector<1x784xf32>
    %108 = arith.subf %106, %107 : vector<1x784xf32>
    %cst_18 = arith.constant 0.000000e+00 : f32
    %109 = vector.broadcast %cst_18 : f32 to vector<1x784xf32>
    %110 = arith.maximumf %108, %109 : vector<1x784xf32>
    %c0_19 = arith.constant 0 : index
    %c0_20 = arith.constant 0 : index
    %111 = vector.load %arg2[%c0_19, %c0_20] : memref<2x784xf32, #tpu.memory_space<vmem>>, vector<1x784xf32>
    %c1_21 = arith.constant 1 : index
    %c0_22 = arith.constant 0 : index
    %112 = vector.load %arg2[%c1_21, %c0_22] : memref<2x784xf32, #tpu.memory_space<vmem>>, vector<1x784xf32>
    %cst_23 = arith.constant 9.99999974E-6 : f32
    %113 = vector.broadcast %cst_23 : f32 to vector<1x784xf32>
    %114 = arith.addf %110, %113 : vector<1x784xf32>
    %115 = math.rsqrt %114 : vector<1x784xf32>
    %116 = arith.mulf %111, %115 : vector<1x784xf32>
    %117 = arith.mulf %104, %116 : vector<1x784xf32>
    %118 = arith.subf %112, %117 : vector<1x784xf32>
    %119 = vector.broadcast %116 : vector<1x784xf32> to vector<8x784xf32>
    %120 = arith.mulf %97, %119 : vector<8x784xf32>
    %121 = vector.broadcast %118 : vector<1x784xf32> to vector<8x784xf32>
    %122 = arith.addf %120, %121 : vector<8x784xf32>
    %cst_24 = arith.constant 2.000000e-01 : f32
    %123 = vector.broadcast %cst_24 : f32 to vector<8x784xf32>
    %124 = arith.mulf %123, %122 : vector<8x784xf32>
    %125 = arith.maximumf %122, %124 : vector<8x784xf32>
    %c0_25 = arith.constant 0 : index
    %c0_26 = arith.constant 0 : index
    %126 = vector.load %arg3[%c0_25, %c0_26] : memref<8x784xf32, #tpu.memory_space<vmem>>, vector<8x784xf32>
    tpu.vector_store %arg3[%c0_25, %c0_26], %125 {strides = array<i32>} : memref<8x784xf32, #tpu.memory_space<vmem>>, vector<8x784xf32>,
    return
  }
}

</mosaic_0001>

<bundles_post_ra>
// kernel: tpu_custom_call.1
= control target key start
LH: loop header
LB: loop body
LE: loop exit
PB: predicated region body
PF: predicated region fallthrough
CT: control target
= control target key end

     0   :  { %8 = vsyncpa [#allocation3], 0  ;;  %s1801_s0 = inlined_call_operand.vmem [shape: s32[8,1], index: 0, kind: input, shape index: {}]   ;;  %s1802_s1 = inlined_call_operand.hbm [shape: f32[12,784], index: 1, kind: input, shape index: {}]   ;;  %s1803_s2 = inlined_call_operand.vmem [shape: f32[2,784], index: 2, kind: input, shape index: {}]   ;;  %s1804_s3 = inlined_call_operand.hbm [shape: f32[8,784], index: 3, kind: output, shape index: {}]  }
   0x1   :  { %9 = vsyncpa [#allocation4], 0  ;;  %s1125_s12 = smov [#allocation2]   ;;  %s1077_s16 = scalar_lea.hbm %s1802_s1, 1792 }
   0x2   :  { %s17_s13 = sshll.u32 %s1125_s12, 4  ;;  %p1078_p0 = scmp.ne.s32.totalorder %s1802_s1, %s1077_s16  ;;  %s18_s13 = int_to_ptr.vmem [resolvable:$true] %s17_s13 }
   0x3   :  { %p1081_p1 = scmp.lt.u32.totalorder %s1077_s16, %s1802_s1 }
   0x5   :  { %p1083_p2 = pnand %p1081_p1, %p1078_p0 }
   0x7   :  { %1086 = shalt.err (!%p1083_p2)
}
   0x8   :  { %s1087_s21 = scalar_lea.vmem %s18_s13, 1792  ;;  %p1092_p4 = scmp.lt.s32.totalorder %s18_s13, %s18_s13 }
   0x9   :  { %p1088_p3 = scmp.ne.s32.totalorder %s18_s13, %s1087_s21  ;;  %p1093_p5 = scmp.lt.s32.totalorder %s1087_s21, %s1087_s21 }
   0xb   :  { %p1094_p6 = por %p1093_p5, %p1092_p4 }
   0xd   :  { %p1095_p7 = pnand %p1094_p6, %p1088_p3 }
   0xf   :  { %1098 = shalt.err (!%p1095_p7)
}
  0x10   :  { %s1126_s22 = smov 896   ;;  %s1127_s23 = smov 56  }
  0x11   :  { %23 = dma.hbm_to_vmem [thread:$0]  %s1802_s1, 1792, %s18_s13, [#allocation3], %s1126_s22, %s1126_s22, %s1127_s23  }
  0x12   :  { %1121 = dma.done.wait [#allocation3], 1792  }
  0x13   :  { %1122 = vsyncadd [#allocation3], 4294965504  ;;  %v1128_v0 = vmov 0   ;;  %v29_v1 = vld [vmem:[%s1801_s0] sm:$0xff]  ;;  %v40_v14 = vlaneseq }
  0x14   :  { %1062 = vset.pattern.permute.xlu1 %v1128_v0  ;;  %1061 = vset.pattern.permute.xlu0 %v1128_v0  ;;  %vm139_vm0 = vcmp.eq.s32.totalorder %v29_v1, 2  ;;  %vm33_vm1 = vcmp.eq.s32.totalorder %v29_v1, 0  ;;  %vm192_vm2 = vcmp.eq.s32.totalorder %v29_v1, 3  ;;  %vm86_vm3 = vcmp.eq.s32.totalorder %v29_v1, 1 }
  0x15   :  { %v140_v2 = vsel %vm139_vm0, 1, %v1128_v0  ;;  %v34_v3 = vsel %vm33_vm1, 1, %v1128_v0  ;;  %v193_v4 = vsel %vm192_vm2, 1, %v1128_v0  ;;  %v87_v5 = vsel %vm86_vm3, 1, %v1128_v0 }
  0x16   :  { %142 = vperm.xlu1 %1062, %v140_v2   ;;  %36 = vperm.xlu0 %1061, %v34_v3   ;;  %vm298_vm4 = vcmp.eq.s32.totalorder %v29_v1, 5  ;;  %vm245_vm5 = vcmp.eq.s32.totalorder %v29_v1, 4  ;;  %vm404_vm6 = vcmp.eq.s32.totalorder %v29_v1, 7  ;;  %vm351_vm7 = vcmp.eq.s32.totalorder %v29_v1, 6 }
  0x17   :  { %v299_v6 = vsel %vm298_vm4, 1, %v1128_v0  ;;  %v246_v7 = vsel %vm245_vm5, 1, %v1128_v0  ;;  %v405_v8 = vsel %vm404_vm6, 1, %v1128_v0  ;;  %v352_v9 = vsel %vm351_vm7, 1, %v1128_v0 }
  0x18   :  { %vm510_vm8 = vcmp.eq.s32.totalorder %v29_v1, 9  ;;  %vm457_vm9 = vcmp.eq.s32.totalorder %v29_v1, 8  ;;  %vm616_vm10 = vcmp.eq.s32.totalorder %v29_v1, 11  ;;  %vm563_vm11 = vcmp.eq.s32.totalorder %v29_v1, 10 }
  0x19   :  { %v511_v10 = vsel %vm510_vm8, 1, %v1128_v0  ;;  %v458_v11 = vsel %vm457_vm9, 1, %v1128_v0  ;;  %v617_v12 = vsel %vm616_vm10, 1, %v1128_v0  ;;  %v564_v13 = vsel %vm563_vm11, 1, %v1128_v0 }
  0x1a   :  { %195 = vperm.xlu1 %1062, %v193_v4   ;;  %89 = vperm.xlu0 %1061, %v87_v5   ;;  %v1166_v15 = vshrl.u32 %v40_v14, 7  ;;  %v30_v16 = vld [vmem:[#allocation2] ss:$8 sm:$0xf]  ;;  %vm701_vm5 = vcmask 130048  }
  0x1b   :  { %v31_v17 = vld [vmem:[#allocation2] ss:$8 sm:$0x70]  ;;  %v83_v22 = vld [vmem:[#allocation2 + $0x1] ss:$8 sm:$0xf] }
  0x1c   :  { %v1169_v18 = vsub.s32 0, %v1166_v15  ;;  %v1172_v19 = vsub.s32 1, %v1166_v15  ;;  %v1175_v20 = vsub.s32 2, %v1166_v15  ;;  %v1178_v21 = vsub.s32 3, %v1166_v15 }
  0x1d   :  { %v84_v23 = vld [vmem:[#allocation2 + $0x1] ss:$8 sm:$0x70]  ;;  %v1180_v24 = vor.u32 %v31_v17, %v30_v16  ;;  %v1183_v25 = vsub.s32 4, %v1166_v15  ;;  %v1186_v26 = vsub.s32 5, %v1166_v15  ;;  %v1189_v27 = vsub.s32 6, %v1166_v15 }
  0x1e   :  { %301 = vperm.xlu1 %1062, %v299_v6   ;;  %248 = vperm.xlu0 %1061, %v246_v7   ;;  %v136_v28 = vld [vmem:[#allocation2 + $0x2] ss:$8 sm:$0xf]  ;;  %v1191_v30 = vor.u32 %v84_v23, %v83_v22  ;;  %v189_v31 = vld [vmem:[#allocation2 + $0x3] ss:$8 sm:$0xf] }
  0x1f   :  { %v137_v29 = vld [vmem:[#allocation2 + $0x2] ss:$8 sm:$0x70]  ;;  %v190_v32 = vld [vmem:[#allocation2 + $0x3] ss:$8 sm:$0x70]  ;;  %v43_v35 = vrot.slane %v1180_v24, %v1169_v18  ;;  %v47_v36 = vrot.slane %v1180_v24, %v1172_v19  ;;  %v51_v37 = vrot.slane %v1180_v24, %v1175_v20  ;;  %v55_v39 = vrot.slane %v1180_v24, %v1178_v21 }
  0x20   :  { %v242_v33 = vld [vmem:[#allocation2 + $0x4] ss:$8 sm:$0xf]  ;;  %v1199_v38 = vor.u32 %v137_v29, %v136_v28  ;;  %v59_v40 = vrot.slane %v1180_v24, %v1183_v25  ;;  %v63_v41 = vrot.slane %v1180_v24, %v1186_v26  ;;  %v67_v42 = vrot.slane %v1180_v24, %v1189_v27  ;;  %v295_v51 = vld [vmem:[#allocation2 + $0x5] ss:$8 sm:$0xf] }
  0x21   :  { %v243_v34 = vld [vmem:[#allocation2 + $0x4] ss:$8 sm:$0x70]  ;;  %v96_v43 = vrot.slane %v1191_v30, %v1169_v18  ;;  %v100_v44 = vrot.slane %v1191_v30, %v1172_v19  ;;  %v1213_v45 = vor.u32 %v190_v32, %v189_v31  ;;  %v104_v47 = vrot.slane %v1191_v30, %v1175_v20  ;;  %v296_v52 = vld [vmem:[#allocation2 + $0x5] ss:$8 sm:$0x70] }
  0x22   :  { %407 = vperm.xlu1 %1062, %v405_v8   ;;  %354 = vperm.xlu0 %1061, %v352_v9   ;;  %v1215_v46 = vor.u32 %v243_v34, %v242_v33  ;;  %v108_v48 = vrot.slane %v1191_v30, %v1178_v21  ;;  %v112_v49 = vrot.slane %v1191_v30, %v1183_v25  ;;  %v348_v57 = vld [vmem:[#allocation2 + $0x6] ss:$8 sm:$0xf]  ;;  %v401_v63 = vld [vmem:[#allocation2 + $0x7] ss:$8 sm:$0xf] }
  0x23   :  { %v116_v50 = vrot.slane %v1191_v30, %v1186_v26  ;;  %v120_v53 = vrot.slane %v1191_v30, %v1189_v27  ;;  %v149_v54 = vrot.slane %v1199_v38, %v1169_v18  ;;  %v153_v55 = vrot.slane %v1199_v38, %v1172_v19  ;;  %v349_v58 = vld [vmem:[#allocation2 + $0x6] ss:$8 sm:$0x70]  ;;  %v402_v0 = vld [vmem:[#allocation2 + $0x7] ss:$8 sm:$0x70] }
  0x24   :  { %v157_v56 = vrot.slane %v1199_v38, %v1175_v20  ;;  %v161_v59 = vrot.slane %v1199_v38, %v1178_v21  ;;  %v165_v60 = vrot.slane %v1199_v38, %v1183_v25  ;;  %v169_v61 = vrot.slane %v1199_v38, %v1186_v26  ;;  %v454_v5 = vld [vmem:[#allocation2 + $0x38] ss:$8 sm:$0xf] }
  0x25   :  { %v173_v62 = vrot.slane %v1199_v38, %v1189_v27  ;;  %v202_v1 = vrot.slane %v1213_v45, %v1169_v18  ;;  %v206_v2 = vrot.slane %v1213_v45, %v1172_v19  ;;  %v210_v3 = vrot.slane %v1213_v45, %v1175_v20  ;;  %v455_v6 = vld [vmem:[#allocation2 + $0x38] ss:$8 sm:$0x70] }
  0x26   :  { %513 = vperm.xlu1 %1062, %v511_v10   ;;  %460 = vperm.xlu0 %1061, %v458_v11   ;;  %v1247_v4 = vor.u32 %v296_v52, %v295_v51  ;;  %v214_v7 = vrot.slane %v1213_v45, %v1178_v21  ;;  %v218_v8 = vrot.slane %v1213_v45, %v1183_v25  ;;  %v507_v11 = vld [vmem:[#allocation2 + $0x39] ss:$8 sm:$0xf]  ;;  %v613_v51 = vld [vmem:[#allocation2 + $0x3b] ss:$8 sm:$0xf] }
  0x27   :  { %v222_v9 = vrot.slane %v1213_v45, %v1186_v26  ;;  %v226_v10 = vrot.slane %v1213_v45, %v1189_v27  ;;  %v259_v14 = vrot.slane %v1215_v46, %v1172_v19  ;;  %v263_v16 = vrot.slane %v1215_v46, %v1175_v20 }
  0x28   :  { %v1263_v17 = vor.u32 %v349_v58, %v348_v57  ;;  %v267_v22 = vrot.slane %v1215_v46, %v1178_v21  ;;  %v271_v23 = vrot.slane %v1215_v46, %v1183_v25  ;;  %v275_v28 = vrot.slane %v1215_v46, %v1186_v26  ;;  %v560_v57 = vld [vmem:[#allocation2 + $0x3a] ss:$8 sm:$0xf] }
  0x29   :  { %v1275_v32 = vor.u32 %v402_v0, %v401_v63  ;;  %v1277_v33 = vor.u32 %v455_v6, %v454_v5  ;;  %v561_v0 = vld [vmem:[#allocation2 + $0x3a] ss:$8 sm:$0x70]  ;;  %v614_v6 = vld [vmem:[#allocation2 + $0x3b] ss:$8 sm:$0x70] }
  0x2a   :  { %619 = vperm.xlu1 %1062, %v617_v12   ;;  %566 = vperm.xlu0 %1061, %v564_v13   ;;  %v508_v12 = vld [vmem:[#allocation2 + $0x39] ss:$8 sm:$0x70]  ;;  %v255_v13 = vrot.slane %v1215_v46, %v1169_v18  ;;  %v1327_v31 = vor.u32 %v561_v0, %v560_v57  ;;  %v1343_v0 = vor.u32 %v614_v6, %v613_v51 }
  0x2b   :  { %v1279_v34 = vor.u32 %v508_v12, %v507_v11 }
  0x2d   :  { %v528_v57 = vrot.slane %v1279_v34, %v1175_v20 }
  0x95   :  { %v143_v63 = vpop.permute.xlu1 %142  ;;  %v37_v29 = vpop.permute.xlu0 %36 }
  0x96   :  { %vm38_vm12 = vcmp.eq.s32.totalorder %v37_v29, 1  ;;  %vm144_vm13 = vcmp.eq.s32.totalorder %v143_v63, 1 }
  0x97   :  { %v75_v12 = vsel %vm38_vm12, %v43_v35, 0.0  ;;  %v76_v6 = vsel %vm38_vm12, %v47_v36, 0.0  ;;  %v77_v5 = vsel %vm38_vm12, %v51_v37, 0.0  ;;  %v78_v35 = vsel %vm38_vm12, %v55_v39, 0.0 }
  0x98   :  { %v79_v58 = vsel %vm38_vm12, %v59_v40, 0.0  ;;  %v80_v36 = vsel %vm38_vm12, %v63_v41, 0.0  ;;  %v81_v37 = vsel %vm38_vm12, %v67_v42, 0.0 }
  0x99   :  { %v196_v52 = vpop.permute.xlu1 %195  ;;  %v90_v51 = vpop.permute.xlu0 %89 }
  0x9a   :  { %vm197_vm14 = vcmp.eq.s32.totalorder %v196_v52, 1  ;;  %vm91_vm15 = vcmp.eq.s32.totalorder %v90_v51, 1  ;;  %v1811_v51 = vrot.slane %v1247_v4, %v1186_v26 }
  0x9b   :  { %v128_v39 = vsel %vm91_vm15, %v96_v43, %v75_v12  ;;  %v129_v40 = vsel %vm91_vm15, %v100_v44, %v76_v6  ;;  %v130_v11 = vsel %vm91_vm15, %v104_v47, %v77_v5  ;;  %v131_v24 = vsel %vm91_vm15, %v108_v48, %v78_v35 }
  0x9c   :  { %v132_v41 = vsel %vm91_vm15, %v112_v49, %v79_v58  ;;  %v133_v42 = vsel %vm91_vm15, %v116_v50, %v80_v36  ;;  %v134_v43 = vsel %vm91_vm15, %v120_v53, %v81_v37  ;;  %v181_v44 = vsel %vm144_vm13, %v149_v54, %v128_v39 }
  0x9d   :  { %v182_v47 = vsel %vm144_vm13, %v153_v55, %v129_v40  ;;  %v183_v48 = vsel %vm144_vm13, %v157_v56, %v130_v11  ;;  %v184_v30 = vsel %vm144_vm13, %v161_v59, %v131_v24  ;;  %v185_v49 = vsel %vm144_vm13, %v165_v60, %v132_v41  ;;  %v302_v50 = vpop.permute.xlu1 %301  ;;  %v249_v53 = vpop.permute.xlu0 %248 }
  0x9e   :  { %v186_v54 = vsel %vm144_vm13, %v169_v61, %v133_v42  ;;  %v187_v55 = vsel %vm144_vm13, %v173_v62, %v134_v43  ;;  %v234_v56 = vsel %vm197_vm14, %v202_v1, %v181_v44  ;;  %v650_v59 = vrot.slane %v1343_v0, %v1189_v27 }
  0x9f   :  { %v235_v60 = vsel %vm197_vm14, %v206_v2, %v182_v47  ;;  %v236_v38 = vsel %vm197_vm14, %v210_v3, %v183_v48  ;;  %v237_v61 = vsel %vm197_vm14, %v214_v7, %v184_v30  ;;  %v238_v62 = vsel %vm197_vm14, %v218_v8, %v185_v49 }
  0xa0   :  { %vm303_vm0 = vcmp.eq.s32.totalorder %v302_v50, 1  ;;  %v239_v1 = vsel %vm197_vm14, %v222_v9, %v186_v54  ;;  %v240_v2 = vsel %vm197_vm14, %v226_v10, %v187_v55  ;;  %vm250_vm1 = vcmp.eq.s32.totalorder %v249_v53, 1 }
  0xa1   :  { %v287_v3 = vsel %vm250_vm1, %v255_v13, %v234_v56  ;;  %v288_v7 = vsel %vm250_vm1, %v259_v14, %v235_v60  ;;  %v289_v8 = vsel %vm250_vm1, %v263_v16, %v236_v38  ;;  %v290_v9 = vsel %vm250_vm1, %v267_v22, %v237_v61  ;;  %v408_v45 = vpop.permute.xlu1 %407  ;;  %v355_v29 = vpop.permute.xlu0 %354 }
  0xa2   :  { %v291_v10 = vsel %vm250_vm1, %v271_v23, %v238_v62  ;;  %v292_v13 = vsel %vm250_vm1, %v275_v28, %v239_v1  ;;  %v1805_v14 = vrot.slane %v1215_v46, %v1189_v27  ;;  %vm409_vm2 = vcmp.eq.s32.totalorder %v408_v45, 1 }
  0xa3   :  { %v1806_v16 = vrot.slane %v1247_v4, %v1169_v18  ;;  %v1807_v58 = vrot.slane %v1247_v4, %v1172_v19  ;;  %v1808_v23 = vrot.slane %v1247_v4, %v1175_v20  ;;  %v1809_v46 = vrot.slane %v1247_v4, %v1178_v21 }
  0xa4   :  { %v293_v52 = vsel %vm250_vm1, %v1805_v14, %v240_v2  ;;  %v1810_v11 = vrot.slane %v1247_v4, %v1183_v25  ;;  %v345_v6 = vsel %vm303_vm0, %v1811_v51, %v292_v13  ;;  %v1812_v35 = vrot.slane %v1247_v4, %v1189_v27 }
  0xa5   :  { %v340_v22 = vsel %vm303_vm0, %v1806_v16, %v287_v3  ;;  %v341_v63 = vsel %vm303_vm0, %v1807_v58, %v288_v7  ;;  %v342_v28 = vsel %vm303_vm0, %v1808_v23, %v289_v8  ;;  %v343_v5 = vsel %vm303_vm0, %v1809_v46, %v290_v9  ;;  %v514_v4 = vpop.permute.xlu1 %513  ;;  %v461_v47 = vpop.permute.xlu0 %460 }
  0xa6   :  { %v344_v12 = vsel %vm303_vm0, %v1810_v11, %v291_v10  ;;  %v346_v36 = vsel %vm303_vm0, %v1812_v35, %v293_v52  ;;  %vm356_vm3 = vcmp.eq.s32.totalorder %v355_v29, 1  ;;  %v1813_v37 = vrot.slane %v1263_v17, %v1169_v18 }
  0xa7   :  { %v1814_v40 = vrot.slane %v1263_v17, %v1172_v19  ;;  %v1815_v41 = vrot.slane %v1263_v17, %v1175_v20  ;;  %v1816_v43 = vrot.slane %v1263_v17, %v1178_v21  ;;  %v1817_v48 = vrot.slane %v1263_v17, %v1183_v25 }
  0xa8   :  { %v393_v39 = vsel %vm356_vm3, %v1813_v37, %v340_v22  ;;  %v1818_v49 = vrot.slane %v1263_v17, %v1186_v26  ;;  %v1819_v53 = vrot.slane %v1263_v17, %v1189_v27  ;;  %vm515_vm4 = vcmp.eq.s32.totalorder %v514_v4, 1 }
  0xa9   :  { %v394_v24 = vsel %vm356_vm3, %v1814_v40, %v341_v63  ;;  %v395_v42 = vsel %vm356_vm3, %v1815_v41, %v342_v28  ;;  %v396_v44 = vsel %vm356_vm3, %v1816_v43, %v343_v5  ;;  %v397_v30 = vsel %vm356_vm3, %v1817_v48, %v344_v12  ;;  %v567_v45 = vpop.permute.xlu0 %566 }
  0xaa   :  { %v398_v50 = vsel %vm356_vm3, %v1818_v49, %v345_v6  ;;  %v399_v54 = vsel %vm356_vm3, %v1819_v53, %v346_v36  ;;  %v1820_v55 = vrot.slane %v1275_v32, %v1169_v18  ;;  %v1821_v60 = vrot.slane %v1275_v32, %v1172_v19 }
  0xab   :  { %v1822_v61 = vrot.slane %v1275_v32, %v1175_v20  ;;  %v1823_v17 = vrot.slane %v1275_v32, %v1178_v21  ;;  %v1824_v2 = vrot.slane %v1275_v32, %v1183_v25  ;;  %v1825_v7 = vrot.slane %v1275_v32, %v1186_v26 }
  0xac   :  { %v446_v56 = vsel %vm409_vm2, %v1820_v55, %v393_v39  ;;  %v447_v38 = vsel %vm409_vm2, %v1821_v60, %v394_v24  ;;  %v1826_v9 = vrot.slane %v1275_v32, %v1189_v27  ;;  %vm462_vm6 = vcmp.eq.s32.totalorder %v461_v47, 1  ;;  %v620_v32 = vpop.permute.xlu1 %619 }
  0xad   :  { %v448_v62 = vsel %vm409_vm2, %v1822_v61, %v395_v42  ;;  %v449_v1 = vsel %vm409_vm2, %v1823_v17, %v396_v44  ;;  %v450_v3 = vsel %vm409_vm2, %v1824_v2, %v397_v30  ;;  %v451_v8 = vsel %vm409_vm2, %v1825_v7, %v398_v50 }
  0xae   :  { %v452_v29 = vsel %vm409_vm2, %v1826_v9, %v399_v54  ;;  %v1827_v10 = vrot.slane %v1277_v33, %v1169_v18  ;;  %v1828_v14 = vrot.slane %v1277_v33, %v1172_v19  ;;  %v1829_v16 = vrot.slane %v1277_v33, %v1175_v20 }
  0xaf   :  { %v1830_v58 = vrot.slane %v1277_v33, %v1178_v21  ;;  %v1831_v23 = vrot.slane %v1277_v33, %v1183_v25  ;;  %v1832_v46 = vrot.slane %v1277_v33, %v1186_v26  ;;  %v1833_v11 = vrot.slane %v1277_v33, %v1189_v27 }
  0xb0   :  { %v499_v13 = vsel %vm462_vm6, %v1827_v10, %v446_v56  ;;  %v500_v52 = vsel %vm462_vm6, %v1828_v14, %v447_v38  ;;  %v501_v22 = vsel %vm462_vm6, %v1829_v16, %v448_v62  ;;  %vm621_vm7 = vcmp.eq.s32.totalorder %v620_v32, 1 }
  0xb1   :  { %v502_v63 = vsel %vm462_vm6, %v1830_v58, %v449_v1  ;;  %v503_v28 = vsel %vm462_vm6, %v1831_v23, %v450_v3  ;;  %v504_v5 = vsel %vm462_vm6, %v1832_v46, %v451_v8  ;;  %v505_v12 = vsel %vm462_vm6, %v1833_v11, %v452_v29 }
  0xb2   :  { %v1834_v51 = vrot.slane %v1279_v34, %v1169_v18  ;;  %v1835_v35 = vrot.slane %v1279_v34, %v1172_v19  ;;  %v554_v37 = vsel %vm515_vm4, %v528_v57, %v501_v22  ;;  %v1836_v33 = vrot.slane %v1279_v34, %v1178_v21 }
  0xb3   :  { %v1837_v40 = vrot.slane %v1279_v34, %v1183_v25  ;;  %v1838_v41 = vrot.slane %v1279_v34, %v1186_v26  ;;  %v1839_v43 = vrot.slane %v1279_v34, %v1189_v27  ;;  %vm568_vm8 = vcmp.eq.s32.totalorder %v567_v45, 1 }
  0xb4   :  { %v552_v6 = vsel %vm515_vm4, %v1834_v51, %v499_v13  ;;  %v553_v36 = vsel %vm515_vm4, %v1835_v35, %v500_v52  ;;  %v555_v39 = vsel %vm515_vm4, %v1836_v33, %v502_v63  ;;  %v1840_v44 = vrot.slane %v1327_v31, %v1169_v18 }
  0xb5   :  { %v556_v24 = vsel %vm515_vm4, %v1837_v40, %v503_v28  ;;  %v557_v42 = vsel %vm515_vm4, %v1838_v41, %v504_v5  ;;  %v558_v57 = vsel %vm515_vm4, %v1839_v43, %v505_v12  ;;  %v1841_v48 = vrot.slane %v1327_v31, %v1172_v19 }
  0xb6   :  { %v605_v47 = vsel %vm568_vm8, %v1840_v44, %v552_v6  ;;  %v1842_v49 = vrot.slane %v1327_v31, %v1175_v20  ;;  %v1843_v53 = vrot.slane %v1327_v31, %v1178_v21  ;;  %v1844_v34 = vrot.slane %v1327_v31, %v1183_v25 }
  0xb7   :  { %v606_v30 = vsel %vm568_vm8, %v1841_v48, %v553_v36  ;;  %v1845_v55 = vrot.slane %v1327_v31, %v1186_v26  ;;  %v1846_v60 = vrot.slane %v1327_v31, %v1189_v27  ;;  %v1847_v61 = vrot.slane %v1343_v0, %v1169_v18 }
  0xb8   :  { %v607_v50 = vsel %vm568_vm8, %v1842_v49, %v554_v37  ;;  %v608_v54 = vsel %vm568_vm8, %v1843_v53, %v555_v39  ;;  %v609_v4 = vsel %vm568_vm8, %v1844_v34, %v556_v24  ;;  %v1848_v17 = vrot.slane %v1343_v0, %v1172_v19 }
  0xb9   :  { %v610_v56 = vsel %vm568_vm8, %v1845_v55, %v557_v42  ;;  %v611_v38 = vsel %vm568_vm8, %v1846_v60, %v558_v57  ;;  %v1658_v62 = vsel %vm621_vm7, %v1847_v61, %v605_v47  ;;  %v1849_v2 = vrot.slane %v1343_v0, %v1175_v20 }
  0xba   :  { %v1664_v1 = vsel %vm621_vm7, %v1848_v17, %v606_v30  ;;  %v1850_v31 = vrot.slane %v1343_v0, %v1178_v21  ;;  %v1851_v8 = vrot.slane %v1343_v0, %v1183_v25  ;;  %v1852_v29 = vrot.slane %v1343_v0, %v1186_v26 }
  0xbb   :  { %v1670_v3 = vsel %vm621_vm7, %v1849_v2, %v607_v50  ;;  %v1694_v13 = vsel %vm621_vm7, %v650_v59, %v611_v38  ;;  %v665_v14 = vrot.slane %v1658_v62, 4  ;;  %v671_v52 = vrot.slane %v1664_v1, 4 }
  0xbc   :  { %v1676_v7 = vsel %vm621_vm7, %v1850_v31, %v608_v54  ;;  %v1682_v9 = vsel %vm621_vm7, %v1851_v8, %v609_v4  ;;  %v1688_v10 = vsel %vm621_vm7, %v1852_v29, %v610_v56  ;;  %v677_v16 = vrot.slane %v1670_v3, 4 }
  0xbd   :  { %v683_v22 = vrot.slane %v1676_v7, 4  ;;  %v689_v58 = vrot.slane %v1682_v9, 4  ;;  %v695_v63 = vrot.slane %v1688_v10, 4  ;;  %v666_v45 = vadd.f32 %v665_v14, %v1658_v62 }
  0xbe   :  { %v672_v23 = vadd.f32 %v671_v52, %v1664_v1  ;;  %v702_v0 = vsel %vm701_vm5, %v1694_v13, 0.0  ;;  %v709_v59 = vmul.f32 %v1658_v62, %v1658_v62  ;;  %v678_v32 = vadd.f32 %v677_v16, %v1670_v3 }
  0xbf   :  { %v684_v28 = vadd.f32 %v683_v22, %v1676_v7  ;;  %v690_v46 = vadd.f32 %v689_v58, %v1682_v9  ;;  %v696_v5 = vadd.f32 %v695_v63, %v1688_v10  ;;  %v667_v11 = vrot.slane %v666_v45, 2 }
  0xc0   :  { %v673_v12 = vrot.slane %v672_v23, 2  ;;  %v703_v51 = vrot.slane %v702_v0, 4  ;;  %v710_v6 = vmul.f32 %v1664_v1, %v1664_v1  ;;  %v679_v35 = vrot.slane %v678_v32, 2 }
  0xc1   :  { %v685_v36 = vrot.slane %v684_v28, 2  ;;  %v691_v37 = vrot.slane %v690_v46, 2  ;;  %v697_v33 = vrot.slane %v696_v5, 2  ;;  %v668_v39 = vadd.f32 %v667_v11, %v666_v45 }
  0xc2   :  { %v674_v40 = vadd.f32 %v673_v12, %v672_v23  ;;  %v704_v24 = vadd.f32 %v703_v51, %v702_v0  ;;  %v711_v41 = vmul.f32 %v1670_v3, %v1670_v3  ;;  %v680_v42 = vadd.f32 %v679_v35, %v678_v32 }
  0xc3   :  { %v686_v43 = vadd.f32 %v685_v36, %v684_v28  ;;  %v692_v57 = vadd.f32 %v691_v37, %v690_v46  ;;  %v698_v44 = vadd.f32 %v697_v33, %v696_v5  ;;  %v669_v47 = vrot.slane %v668_v39, 1 }
  0xc4   :  { %v675_v48 = vrot.slane %v674_v40, 1  ;;  %v705_v30 = vrot.slane %v704_v24, 2  ;;  %v712_v49 = vmul.f32 %v1676_v7, %v1676_v7  ;;  %v681_v50 = vrot.slane %v680_v42, 1 }
  0xc5   :  { %v687_v53 = vrot.slane %v686_v43, 1  ;;  %v693_v54 = vrot.slane %v692_v57, 1  ;;  %v699_v34 = vrot.slane %v698_v44, 1  ;;  %v670_v4 = vadd.f32 %v669_v47, %v668_v39 }
  0xc6   :  { %v676_v55 = vadd.f32 %v675_v48, %v674_v40  ;;  %v706_v56 = vadd.f32 %v705_v30, %v704_v24  ;;  %v713_v60 = vmul.f32 %v1682_v9, %v1682_v9  ;;  %v682_v38 = vadd.f32 %v681_v50, %v680_v42 }
  0xc7   :  { %v688_v61 = vadd.f32 %v687_v53, %v686_v43  ;;  %v694_v17 = vadd.f32 %v693_v54, %v692_v57  ;;  %v700_v2 = vadd.f32 %v699_v34, %v698_v44  ;;  %v714_v8 = vmul.f32 %v1688_v10, %v1688_v10 }
  0xc8   :  { %v707_v31 = vrot.slane %v706_v56, 1  ;;  %v715_v29 = vmul.f32 %v1694_v13, %v1694_v13  ;;  %v716_v14 = vrot.slane %v709_v59, 4  ;;  %v722_v52 = vrot.slane %v710_v6, 4 }
  0xc9   :  { %v728_v16 = vrot.slane %v711_v41, 4  ;;  %v734_v22 = vrot.slane %v712_v49, 4  ;;  %v740_v58 = vrot.slane %v713_v60, 4  ;;  %v746_v23 = vrot.slane %v714_v8, 4 }
  0xca   :  { %v708_v63 = vadd.f32 %v707_v31, %v706_v56  ;;  %v717_v45 = vadd.f32 %v716_v14, %v709_v59  ;;  %v752_v0 = vsel %vm701_vm5, %v715_v29, 0.0  ;;  %v723_v32 = vadd.f32 %v722_v52, %v710_v6 }
  0xcb   :  { %v729_v28 = vadd.f32 %v728_v16, %v711_v41  ;;  %v735_v46 = vadd.f32 %v734_v22, %v712_v49  ;;  %v741_v5 = vadd.f32 %v740_v58, %v713_v60  ;;  %v747_v12 = vadd.f32 %v746_v23, %v714_v8 }
  0xcc   :  { %v718_v11 = vrot.slane %v717_v45, 2  ;;  %v753_v51 = vrot.slane %v752_v0, 4  ;;  %v1725_v35 = vmul.f32 0.125, %v670_v4  ;;  %v724_v36 = vrot.slane %v723_v32, 2 }
  0xcd   :  { %v730_v37 = vrot.slane %v729_v28, 2  ;;  %v736_v33 = vrot.slane %v735_v46, 2  ;;  %v742_v39 = vrot.slane %v741_v5, 2  ;;  %v748_v24 = vrot.slane %v747_v12, 2 }
  0xce   :  { %v719_v40 = vadd.f32 %v718_v11, %v717_v45  ;;  %v754_v42 = vadd.f32 %v753_v51, %v752_v0  ;;  %v1727_v59 = vmul.f32 0.125, %v676_v55  ;;  %v725_v43 = vadd.f32 %v724_v36, %v723_v32 }
  0xcf   :  { %v731_v57 = vadd.f32 %v730_v37, %v729_v28  ;;  %v737_v6 = vadd.f32 %v736_v33, %v735_v46  ;;  %v743_v41 = vadd.f32 %v742_v39, %v741_v5  ;;  %v749_v47 = vadd.f32 %v748_v24, %v747_v12 }
  0xd0   :  { %v720_v44 = vrot.slane %v719_v40, 1  ;;  %v755_v48 = vrot.slane %v754_v42, 2  ;;  %v1729_v30 = vmul.f32 0.125, %v682_v38  ;;  %v726_v49 = vrot.slane %v725_v43, 1 }
  0xd1   :  { %v732_v50 = vrot.slane %v731_v57, 1  ;;  %v738_v53 = vrot.slane %v737_v6, 1  ;;  %v744_v54 = vrot.slane %v743_v41, 1  ;;  %v750_v4 = vrot.slane %v749_v47, 1 }
  0xd2   :  { %v721_v34 = vadd.f32 %v720_v44, %v719_v40  ;;  %v756_v56 = vadd.f32 %v755_v48, %v754_v42  ;;  %v1731_v60 = vmul.f32 0.125, %v688_v61  ;;  %v727_v55 = vadd.f32 %v726_v49, %v725_v43 }
  0xd3   :  { %v733_v31 = vadd.f32 %v732_v50, %v731_v57  ;;  %v739_v8 = vadd.f32 %v738_v53, %v737_v6  ;;  %v745_v29 = vadd.f32 %v744_v54, %v743_v41  ;;  %v751_v14 = vadd.f32 %v750_v4, %v749_v47 }
  0xd4   :  { %v757_v52 = vrot.slane %v756_v56, 1  ;;  %v1733_v16 = vmul.f32 0.125, %v694_v17  ;;  %v1735_v22 = vmul.f32 0.125, %v700_v2  ;;  %v1737_v38 = vmul.f32 0.125, %v708_v63 }
  0xd5   :  { %v766_v58 = vmul.f32 0.125, %v721_v34  ;;  %v767_v45 = vmul.f32 0.125, %v727_v55  ;;  %v768_v23 = vmul.f32 0.125, %v733_v31  ;;  %v769_v32 = vmul.f32 0.125, %v739_v8 }
  0xd6   :  { %v758_v0 = vadd.f32 %v757_v52, %v756_v56  ;;  %v770_v28 = vmul.f32 0.125, %v745_v29  ;;  %v771_v61 = vmul.f32 0.125, %v751_v14  ;;  %v773_v46 = vmul.f32 %v1725_v35, %v1725_v35 }
  0xd7   :  { %v774_v5 = vmul.f32 %v1727_v59, %v1727_v59  ;;  %v775_v17 = vmul.f32 %v1729_v30, %v1729_v30  ;;  %v776_v2 = vmul.f32 %v1731_v60, %v1731_v60  ;;  %v777_v11 = vmul.f32 %v1733_v16, %v1733_v16 }
  0xd8   :  { %v772_v63 = vmul.f32 0.125, %v758_v0  ;;  %v778_v12 = vmul.f32 %v1735_v22, %v1735_v22  ;;  %v779_v51 = vmul.f32 %v1737_v38, %v1737_v38  ;;  %v780_v36 = vsub.f32 %v766_v58, %v773_v46 }
  0xd9   :  { %v781_v37 = vsub.f32 %v767_v45, %v774_v5  ;;  %v782_v33 = vsub.f32 %v768_v23, %v775_v17  ;;  %v783_v39 = vsub.f32 %v769_v32, %v776_v2  ;;  %v784_v40 = vsub.f32 %v770_v28, %v777_v11 }
  0xda   :  { %v785_v24 = vsub.f32 %v771_v61, %v778_v12  ;;  %v786_v42 = vsub.f32 %v772_v63, %v779_v51  ;;  %v787_v43 = vmax.f32 %v780_v36, 0.0  ;;  %v1129_v56 = vmov 1966171168  }
  0xdb   :  { %v788_v57 = vmax.f32 %v781_v37, 0.0  ;;  %v789_v6 = vmax.f32 %v782_v33, 0.0  ;;  %v790_v41 = vmax.f32 %v783_v39, 0.0  ;;  %v791_v44 = vmax.f32 %v784_v40, 0.0 }
  0xdc   :  { %v792_v47 = vmax.f32 %v785_v24, 0.0  ;;  %v793_v48 = vmax.f32 %v786_v42, 0.0  ;;  %v797_v49 = vadd.f32 1e-05, %v787_v43  ;;  %v822_v55 = vunpack.c.l.s4 %v1129_v56 }
  0xdd   :  { %v798_v50 = vadd.f32 1e-05, %v788_v57  ;;  %v799_v53 = vadd.f32 1e-05, %v789_v6  ;;  %v800_v54 = vadd.f32 1e-05, %v790_v41 }
  0xde   :  { %v801_v34 = vadd.f32 1e-05, %v791_v44  ;;  %1063 = vrsqrt.f32 %v797_v49  ;;  %v802_v4 = vadd.f32 1e-05, %v792_v47  ;;  %v803_v31 = vadd.f32 1e-05, %v793_v48 }
  0xdf   :  { %1065 = vrsqrt.f32 %v798_v50  ;;  %v823_v8 = vunpack.c.0.s8 %v822_v55 }
  0xe0   :  { %1067 = vrsqrt.f32 %v799_v53 }
  0xe1   :  { %1069 = vrsqrt.f32 %v800_v54  ;;  %v826_v14 = vsub.s32 %v823_v8, %v1166_v15  ;;  %v794_v15 = vld [vmem:[%s1803_s2] ss:$2 sm:$0x7f] }
  0xe2   :  { %1071 = vrsqrt.f32 %v801_v34 }
  0xe3   :  { %1073 = vrsqrt.f32 %v802_v4 }
  0xe4   :  { %1075 = vrsqrt.f32 %v803_v31 }
  0xe8   :  { %v1064_v29 = vpop.eup %1063 }
  0xe9   :  { %v1066_v52 = vpop.eup %1065 }
  0xea   :  { %v1068_v58 = vpop.eup %1067  ;;  %v818_v45 = vcombine.low %v1064_v29, %v1066_v52 }
  0xeb   :  { %v1070_v23 = vpop.eup %1069 }
  0xec   :  { %v1072_v0 = vpop.eup %1071  ;;  %v819_v32 = vcombine.low %v1068_v58, %v1070_v23  ;;  %v827_v28 = vrot.slane %v818_v45, %v826_v14 }
  0xed   :  { %v1074_v61 = vpop.eup %1073 }
  0xee   :  { %v1076_v46 = vpop.eup %1075  ;;  %v820_v5 = vcombine.low %v1072_v0, %v1074_v61  ;;  %v834_v17 = vrot.slane %v819_v32, %v826_v14 }
  0xef   :  { %v848_v2 = vrot.slane %v1076_v46, %v826_v14 }
  0xf0   :  { %v841_v63 = vrot.slane %v820_v5, %v826_v14  ;;  %v849_v11 = vcombine.low %v827_v28, %v834_v17 }
  0xf2   :  { %v850_v12 = vcombine.low %v841_v63, %v848_v2  ;;  %v857_v51 = vrot.slane %v849_v11, %v826_v14 }
  0xf4   :  { %v864_v36 = vrot.slane %v850_v12, %v826_v14 }
  0xf6   :  { %v865_v37 = vcombine.low %v857_v51, %v864_v36 }
  0xf8   :  { %v867_v33 = vmul.f32 %v865_v37, %v794_v15 }
  0xfa   :  { %v872_v39 = vrot.slane %v867_v33, %v1169_v18  ;;  %v876_v40 = vrot.slane %v867_v33, %v1172_v19  ;;  %v880_v24 = vrot.slane %v867_v33, %v1175_v20  ;;  %v884_v42 = vrot.slane %v867_v33, %v1178_v21 }
  0xfb   :  { %v888_v43 = vrot.slane %v867_v33, %v1183_v25  ;;  %v892_v57 = vrot.slane %v867_v33, %v1186_v26  ;;  %v896_v6 = vrot.slane %v867_v33, %v1189_v27 }
  0xfc   :  { %v904_v41 = vmul.f32 %v872_v39, %v1725_v35  ;;  %v905_v44 = vmul.f32 %v876_v40, %v1727_v59  ;;  %v906_v47 = vmul.f32 %v880_v24, %v1729_v30  ;;  %v907_v48 = vmul.f32 %v884_v42, %v1731_v60  ;;  %v1054_v30 = vld [vmem:[%s1803_s2 + $0x1] ss:$2 sm:$0x7f]  ;;  %s1130_s2 = smov [#allocation5]  }
  0xfd   :  { %v908_v49 = vmul.f32 %v888_v43, %v1733_v16  ;;  %v909_v50 = vmul.f32 %v892_v57, %v1735_v22  ;;  %v910_v53 = vmul.f32 %v896_v6, %v1737_v38  ;;  %v968_v22 = vmul.f32 %v872_v39, %v1658_v62  ;;  %s1045_s30 = sshll.u32 %s1130_s2, 4  ;;  %s1046_s30 = int_to_ptr.vmem [resolvable:$true] %s1045_s30 }
  0xfe   :  { %v918_v54 = vcombine.low %v904_v41, %v905_v44  ;;  %v919_v34 = vcombine.low %v906_v47, %v907_v48  ;;  %v969_v38 = vmul.f32 %v876_v40, %v1664_v1  ;;  %v970_v58 = vmul.f32 %v880_v24, %v1670_v3  ;;  %s1099_s4 = scalar_lea.vmem %s1046_s30, 896  ;;  %p1104_p9 = scmp.lt.s32.totalorder %s1046_s30, %s1046_s30 }
  0xff   :  { %v920_v4 = vcombine.low %v908_v49, %v909_v50  ;;  %v948_v8 = vrot.slane %v910_v53, %v826_v14  ;;  %v971_v45 = vmul.f32 %v884_v42, %v1676_v7  ;;  %v972_v23 = vmul.f32 %v888_v43, %v1682_v9  ;;  %p1100_p8 = scmp.ne.s32.totalorder %s1046_s30, %s1099_s4  ;;  %p1105_p10 = scmp.lt.s32.totalorder %s1099_s4, %s1099_s4 }
 0x100   :  { %v927_v56 = vrot.slane %v918_v54, %v826_v14  ;;  %v934_v55 = vrot.slane %v919_v34, %v826_v14  ;;  %v973_v0 = vmul.f32 %v892_v57, %v1688_v10  ;;  %v974_v62 = vmul.f32 %v896_v6, %v1694_v13 }
 0x101   :  { %v941_v31 = vrot.slane %v920_v4, %v826_v14  ;;  %p1106_p11 = por %p1105_p10, %p1104_p9 }
 0x102   :  { %v949_v35 = vcombine.low %v927_v56, %v934_v55 }
 0x103   :  { %v950_v29 = vcombine.low %v941_v31, %v948_v8  ;;  %p1107_p12 = pnand %p1106_p11, %p1100_p8 }
 0x104   :  { %v957_v59 = vrot.slane %v949_v35, %v826_v14 }
 0x105   :  { %v964_v52 = vrot.slane %v950_v29, %v826_v14 }
 0x107   :  { %v965_v60 = vcombine.low %v957_v59, %v964_v52 }
 0x109   :  { %v967_v16 = vsub.f32 %v1054_v30, %v965_v60 }
 0x10b   :  { %v979_v14 = vrot.slane %v967_v16, %v1169_v18  ;;  %v983_v32 = vrot.slane %v967_v16, %v1172_v19  ;;  %v987_v28 = vrot.slane %v967_v16, %v1175_v20  ;;  %v991_v61 = vrot.slane %v967_v16, %v1178_v21 }
 0x10c   :  { %v995_v1 = vrot.slane %v967_v16, %v1183_v25  ;;  %v999_v3 = vrot.slane %v967_v16, %v1186_v26  ;;  %v1003_v7 = vrot.slane %v967_v16, %v1189_v27 }
 0x10d   :  { %v1011_v46 = vadd.f32 %v979_v14, %v968_v22  ;;  %v1012_v9 = vadd.f32 %v983_v32, %v969_v38  ;;  %v1013_v5 = vadd.f32 %v987_v28, %v970_v58  ;;  %v1014_v10 = vadd.f32 %v991_v61, %v971_v45 }
 0x10e   :  { %v1015_v17 = vadd.f32 %v995_v1, %v972_v23  ;;  %v1016_v18 = vadd.f32 %v999_v3, %v973_v0  ;;  %v1017_v2 = vadd.f32 %v1003_v7, %v974_v62 }
 0x10f   :  { %v1018_v19 = vmul.f32 0.2, %v1011_v46  ;;  %v1019_v20 = vmul.f32 0.2, %v1012_v9  ;;  %v1020_v21 = vmul.f32 0.2, %v1013_v5 }
 0x110   :  { %v1021_v63 = vmul.f32 0.2, %v1014_v10  ;;  %v1022_v13 = vmul.f32 0.2, %v1015_v17  ;;  %v1023_v11 = vmul.f32 0.2, %v1016_v18 }
 0x111   :  { %v1024_v25 = vmul.f32 0.2, %v1017_v2  ;;  %v1025_v12 = vmax.f32 %v1011_v46, %v1018_v19  ;;  %v1026_v26 = vmax.f32 %v1012_v9, %v1019_v20  ;;  %v1027_v51 = vmax.f32 %v1013_v5, %v1020_v21 }
 0x112   :  { %v1028_v27 = vmax.f32 %v1014_v10, %v1021_v63  ;;  %v1029_v36 = vmax.f32 %v1015_v17, %v1022_v13  ;;  %v1030_v15 = vmax.f32 %v1016_v18, %v1023_v11 }
 0x113   :  { %v1031_v37 = vmax.f32 %v1017_v2, %v1024_v25  ;;  %1032 = vst [vmem:[#allocation5] sm:$0xff] %v1025_v12  ;;  %1033 = vst [vmem:[#allocation5 + $0x8] sm:$0xff] %v1026_v26 }
 0x114   :  { %1034 = vst [vmem:[#allocation5 + $0x10] sm:$0xff] %v1027_v51  ;;  %1035 = vst [vmem:[#allocation5 + $0x18] sm:$0xff] %v1028_v27 }
 0x115   :  { %1036 = vst [vmem:[#allocation5 + $0x20] sm:$0xff] %v1029_v36  ;;  %1037 = vst [vmem:[#allocation5 + $0x28] sm:$0xff] %v1030_v15 }
 0x116   :  { %1038 = vst.msk [vmem:[#allocation5 + $0x30] sm:$0xff] %vm701_vm5, %v1031_v37 }
 0x117   :  { %1110 = shalt.err (!%p1107_p12)
}
 0x118   :  { %s1111_s7 = scalar_lea.hbm %s1804_s3, 896 }
 0x119   :  { %p1112_p13 = scmp.ne.s32.totalorder %s1804_s3, %s1111_s7  ;;  %p1115_p0 = scmp.lt.u32.totalorder %s1111_s7, %s1804_s3 }
 0x11b   :  { %p1117_p1 = pnand %p1115_p0, %p1112_p13 }
 0x11d   :  { %1120 = shalt.err (!%p1117_p1)
}
 0x11e   :  { %1048 = dma.vmem_to_hbm [thread:$0]  %s1046_s30, 896, %s1804_s3, [#allocation4]  }
 0x11f   :  { %1123 = dma.done.wait [#allocation4], 896  }
 0x120   :  { %1124 = vsyncadd [#allocation4], 4294966400 }
 0x121   :  { %1052 = vsyncpa [#allocation3], 1 }
 0x122   :  { %1053 = vsyncpa [#allocation4], 1 }

</bundles_post_ra>
